<compile_context>
chip_gen: v5e
topology: v5e:2x2
jax: 0.10.0
libtpu: 0.0.40
codegen_flags: <defaults>
</compile_context>

<pallas_src>
import functools

import jax
import jax.numpy as jnp
from jax import lax
from jax.experimental import pallas as pl
from jax.experimental.pallas import tpu as pltpu


_SCALE_NONE, _SCALE_SEP, _SCALE_FULL = 0, 1, 2


def _round_up(x, m):
    return (x + m - 1) // m * m


def _pad2(a, rows, cols):
    pr, pc = rows - a.shape[0], cols - a.shape[1]
    if pr or pc:
        a = jnp.pad(a, ((0, pr), (0, pc)))
    return a


def _choose_tile(dim, preferred, align):
    """Pick tile <= preferred that divides the minimally aligned dim.

    Returns (tile, padded_dim). Padding stays at the alignment granule whenever
    an aligned divisor exists, so large operands are not re-padded to full tile
    multiples just to satisfy the grid.
    """
    preferred = max(align, preferred // align * align)
    dp = _round_up(max(dim, 1), align)
    if dp <= preferred:
        return dp, dp
    t = preferred
    while t >= align:
        if dp % t == 0:
            return t, dp
        t -= align
    return preferred, _round_up(dp, preferred)


def _lora_linear_kernel(*refs, scale_mode, has_lora):
    """out[i,j] = (x[i] @ w_eff[j].T) (+ lora corr) (* mb) + bias[j]."""
    acc_ref = refs[-1]          # f32 VMEM accumulator scratch
    o_ref = refs[-2]            # output tile
    b_ref = refs[-3]            # bias row (1, tn), f32
    it = iter(refs[:-3])
    x_ref = next(it)            # (tm, tk) bf16 (ma already folded if SEP)
    w_ref = next(it)            # (tn, tk) bf16
    mb_row_ref = ma_ref = mb_ref = xa_ref = lb_ref = None
    if scale_mode == _SCALE_SEP:
        mb_row_ref = next(it)   # (1, tn) f32
    elif scale_mode == _SCALE_FULL:
        ma_ref = next(it)       # (s_pad, tk) f32 (already / scaling_rank)
        mb_ref = next(it)       # (tn, s_pad) f32
    if has_lora:
        xa_ref = next(it)       # (tm, r_pad) f32  (x @ (la/r).T, padded)
        lb_ref = next(it)       # (tn, r_pad) f32

    k = pl.program_id(2)

    @pl.when(k == 0)
    def _():
        acc_ref[...] = jnp.zeros_like(acc_ref)

    w = w_ref[...]
    if scale_mode == _SCALE_FULL:
        # Per-tile multiplicative rescale (mb @ ma), computed on the fly so the
        # fused weight never round-trips through HBM.
        scale = lax.dot_general(
            mb_ref[...], ma_ref[...],
            dimension_numbers=(((1,), (0,)), ((), ())),
            preferred_element_type=jnp.float32)
        w = (w.astype(jnp.float32) * scale).astype(w_ref.dtype)

    # Contract the last dims of x (tm,tk) and w (tn,tk): x @ w.T, no transpose.
    acc_ref[...] += lax.dot_general(
        x_ref[...], w,
        dimension_numbers=(((1,), (1,)), ((), ())),
        preferred_element_type=jnp.float32)

    @pl.when(k == pl.num_programs(2) - 1)
    def _():
        out = acc_ref[...]
        if scale_mode == _SCALE_SEP:
            out = out * mb_row_ref[...]          # row-scale, (tm,tn)*(1,tn)
        if has_lora:
            # (tm, r) x (tn, r)^T -> (tm, tn), once per output tile.
            out = out + lax.dot_general(
                xa_ref[...], lb_ref[...],
                dimension_numbers=(((1,), (1,)), ((), ())),
                preferred_element_type=jnp.float32)
        o_ref[...] = (out + b_ref[...]).astype(o_ref.dtype)


def lora_linear(x, weight, bias, multi_lora_a, multi_lora_b, lora_a, lora_b,
                *, rank, scaling_rank, tm=512, tn=512, tk=1024,
                mxu_dtype=jnp.bfloat16):
    """Pallas implementation of LoRALinear.forward (general branch)."""
    # TODO(synk): the requires_grad-gated fast path in the PyTorch forward
    # (rank == 0 and scaling_rank == 1) is train-state dependent; this wrapper
    # always applies the general-branch math (equivalent when params are live).
    *lead, K = x.shape
    N, K_w = weight.shape
    assert K_w == K
    x2 = x.reshape(-1, K)
    M = x2.shape[0]
    f32 = jnp.float32

    has_lora = rank > 0
    if scaling_rank == 1:
        scale_mode = _SCALE_SEP
    elif scaling_rank:
        scale_mode = _SCALE_FULL
    else:
        scale_mode = _SCALE_NONE

    # ---- LoRA additive term: skinny (M, r) factor computed once from the
    #      UNscaled x (the additive term does not see the multiplicative ma).
    if has_lora:
        xa = x2.astype(f32) @ (lora_a.astype(f32).T / rank)    # (M, rank)
        lb = lora_b.astype(f32)                                # (N, rank)

    # ---- Tile sizes snapped to divisors of the minimally aligned dims.
    tm, Mp = _choose_tile(M, tm, 16)
    tn, Np = _choose_tile(N, tn, 128)
    tk, Kp = _choose_tile(K, tk, 128)

    # ---- Main-matmul operands: fold scales in f32, then cast for the MXU.
    if scale_mode == _SCALE_SEP:
        x_main = x2.astype(f32) * multi_lora_a.reshape(1, K).astype(f32)
        mb_row = _pad2(multi_lora_b.reshape(1, N).astype(f32), 1, Np)
    else:
        x_main = x2
    x_main = _pad2(x_main, Mp, Kp).astype(mxu_dtype)   # pad+cast fuse in XLA
    w_main = _pad2(weight, Np, Kp).astype(mxu_dtype)

    if scale_mode == _SCALE_FULL:
        s_pad = _round_up(scaling_rank, 8)
        ma_full = _pad2((multi_lora_a / scaling_rank).astype(f32), s_pad, Kp)
        mb_full = _pad2(multi_lora_b.astype(f32), Np, s_pad)

    if has_lora:
        r_pad = _round_up(rank, 128)                   # lane-dense epilogue loads
        xa = _pad2(xa, Mp, r_pad)
        lb = _pad2(lb, Np, r_pad)

    bias2 = _pad2(bias.reshape(1, N).astype(f32), 1, Np)

    # ---- Operands / BlockSpecs (branches that are off contribute no inputs).
    operands = [x_main, w_main]
    in_specs = [pl.BlockSpec((tm, tk), lambda i, j, k: (i, k)),       # x
                pl.BlockSpec((tn, tk), lambda i, j, k: (j, k))]       # weight
    if scale_mode == _SCALE_SEP:
        operands.append(mb_row)
        in_specs.append(pl.BlockSpec((1, tn), lambda i, j, k: (0, j)))
    elif scale_mode == _SCALE_FULL:
        operands += [ma_full, mb_full]
        in_specs += [pl.BlockSpec((s_pad, tk), lambda i, j, k: (0, k)),
                     pl.BlockSpec((tn, s_pad), lambda i, j, k: (j, 0))]
    if has_lora:
        operands += [xa, lb]
        in_specs += [pl.BlockSpec((tm, r_pad), lambda i, j, k: (i, 0)),
                     pl.BlockSpec((tn, r_pad), lambda i, j, k: (j, 0))]
    operands.append(bias2)
    in_specs.append(pl.BlockSpec((1, tn), lambda i, j, k: (0, j)))

    out_dtype = x.dtype

    # ---- VMEM budget (double-buffered tiles + f32 accumulator) with headroom;
    #      kept well under v7x's 64 MiB physical VMEM at the default tiling.
    isz = lambda dt: jnp.dtype(dt).itemsize
    est = (2 * tm * tk * isz(mxu_dtype) + 2 * tn * tk * isz(mxu_dtype)
           + 2 * tm * tn * isz(out_dtype) + tm * tn * 4 + 4 * tn * 4)
    if has_lora:
        est += 2 * (tm + tn) * r_pad * 4
    if scale_mode == _SCALE_FULL:
        est += 2 * (s_pad * tk + tn * s_pad) * 4
    vmem_limit = int(min(max(2 * est, 32 * 1024 * 1024), 64 * 1024 * 1024))

    kernel = functools.partial(_lora_linear_kernel,
                               scale_mode=scale_mode, has_lora=has_lora)

    out2 = pl.pallas_call(
        kernel,
        out_shape=jax.ShapeDtypeStruct((Mp, Np), out_dtype),
        grid_spec=pltpu.PrefetchScalarGridSpec(
            num_scalar_prefetch=0,
            grid=(Mp // tm, Np // tn, Kp // tk),
            in_specs=in_specs,
            out_specs=pl.BlockSpec((tm, tn), lambda i, j, k: (i, j)),
            scratch_shapes=[pltpu.VMEM((tm, tn), jnp.float32)],
        ),
        compiler_params=pltpu.CompilerParams(
            dimension_semantics=("parallel", "parallel", "arbitrary"),
            vmem_limit_bytes=vmem_limit),
    )(*operands)

    return out2[:M, :N].reshape(*lead, N)


def lora_linear_reference(x, weight, bias, multi_lora_a, multi_lora_b,
                          lora_a, lora_b, *, rank, scaling_rank):
    """Plain-JAX f32 reference matching the PyTorch forward (general branch)."""
    w = weight
    if scaling_rank:
        w = w * (multi_lora_b @ multi_lora_a) / scaling_rank
    if rank:
        w = w + (lora_b @ lora_a) / rank
    return x @ w.T + bias


def _run_case(name, key, B, S, in_features, out_features, rank, scaling_rank,
              init_scale=-0.1):
    k_w, k_b, k_la, k_lb, k_ma, k_mb, k_x = jax.random.split(key, 7)

    weight = jax.random.normal(k_w, (out_features, in_features), jnp.float32) * 0.05
    bias = jax.random.normal(k_b, (out_features,), jnp.float32) * 0.05

    if rank > 0:
        lora_a = jax.random.normal(k_la, (rank, in_features), jnp.float32) * init_scale
        lora_b = jax.random.normal(k_lb, (out_features, rank), jnp.float32) * init_scale
    else:
        lora_a = jnp.zeros((1, in_features), jnp.float32)
        lora_b = jnp.zeros((out_features, 1), jnp.float32)

    if scaling_rank > 0:
        multi_lora_a = (jnp.ones((scaling_rank, in_features), jnp.float32)
                        + jax.random.normal(k_ma, (scaling_rank, in_features),
                                            jnp.float32) * init_scale)
        multi_lora_b = (jnp.ones((out_features, scaling_rank), jnp.float32)
                        + jax.random.normal(k_mb, (out_features, scaling_rank),
                                            jnp.float32) * init_scale)
    else:
        multi_lora_a = jnp.ones((1, in_features), jnp.float32)
        multi_lora_b = jnp.ones((out_features, 1), jnp.float32)

    x = jax.random.normal(k_x, (B, S, in_features), jnp.float32)

    out = lora_linear(x, weight, bias, multi_lora_a, multi_lora_b,
                      lora_a, lora_b, rank=rank, scaling_rank=scaling_rank)
    out = jax.block_until_ready(out)

    ref = lora_linear_reference(x, weight, bias, multi_lora_a, multi_lora_b,
                                lora_a, lora_b, rank=rank,
                                scaling_rank=scaling_rank)

    assert out.shape == (B, S, out_features)
    err = jnp.max(jnp.abs(out - ref))
    # bf16 MXU operands with f32 accumulation: tolerance loosened accordingly.
    assert jnp.allclose(out, ref, atol=3e-2, rtol=2e-2), \
        f"{name}: max abs diff = {err}"


if __name__ == "__main__":
    key = jax.random.PRNGKey(0)
    k1, k2, k3, k4, k5 = jax.random.split(key, 5)

    # Main config (general branch: rank > 0, scaling_rank == 1), aligned dims.
    _run_case("main", k1, B=2, S=64, in_features=256, out_features=256,
              rank=4, scaling_rank=1)

    # Non-divisible dims exercise the padding path (scaling_rank == 1 math).
    _run_case("padded", k2, B=3, S=7, in_features=200, out_features=160,
              rank=3, scaling_rank=1)

    # scaling_rank >= 2 exercises the in-kernel (mb @ ma) rescale path.
    _run_case("scale_full", k3, B=2, S=16, in_features=192, out_features=224,
              rank=4, scaling_rank=2)

    # rank == 0 path (no LoRA operands passed to the kernel at all).
    _run_case("rank0", k4, B=2, S=8, in_features=128, out_features=128,
              rank=0, scaling_rank=1)

    # scaling_rank == 0 path (no multiplicative rescale).
    _run_case("noscale", k5, B=2, S=8, in_features=128, out_features=96,
              rank=4, scaling_rank=0)

    print("KERNEL_OK")
</pallas_src>

<mosaic_0001>
module attributes {stable_mosaic.version = 11 : i64} {
  func.func @_lora_linear_kernel(%arg0: i32, %arg1: i32, %arg2: i32, %arg3: memref<128x256xbf16, #tpu.memory_space<vmem>>, %arg4: memref<256x256xbf16, #tpu.memory_space<vmem>>, %arg5: memref<1x256xf32, #tpu.memory_space<vmem>>, %arg6: memref<128x128xf32, #tpu.memory_space<vmem>>, %arg7: memref<256x128xf32, #tpu.memory_space<vmem>>, %arg8: memref<1x256xf32, #tpu.memory_space<vmem>>, %arg9: memref<128x256xf32, #tpu.memory_space<vmem>>, %arg10: memref<128x256xf32, #tpu.memory_space<vmem>>) attributes {dimension_semantics = [#tpu.dimension_semantics<parallel>, #tpu.dimension_semantics<parallel>, #tpu.dimension_semantics<arbitrary>], iteration_bounds = array<i64: 1, 1, 1>, scalar_prefetch = 0 : i64, scratch_operands = 1 : i64, tpu.core_type = #tpu.core_type<tc>, window_params = [{transform_indices = @transform_0, window_bounds = array<i64: 128, 256>}, {transform_indices = @transform_1, window_bounds = array<i64: 256, 256>}, {transform_indices = @transform_2, window_bounds = array<i64: 1, 256>}, {transform_indices = @transform_3, window_bounds = array<i64: 128, 128>}, {transform_indices = @transform_4, window_bounds = array<i64: 256, 128>}, {transform_indices = @transform_5, window_bounds = array<i64: 1, 256>}, {transform_indices = @transform_6, window_bounds = array<i64: 128, 256>}]} {
    %c0_i32 = arith.constant 0 : i32
    %0 = arith.cmpi eq, %arg2, %c0_i32 : i32
    %1 = arith.extui %0 : i1 to i32
    %c0_i32_0 = arith.constant 0 : i32
    %2 = arith.cmpi ne, %1, %c0_i32_0 : i32
    scf.if %2 {
      %cst_10 = arith.constant 0.000000e+00 : f32
      %12 = vector.broadcast %cst_10 : f32 to vector<128x256xf32>
      %c0_11 = arith.constant 0 : index
      %c0_12 = arith.constant 0 : index
      %13 = vector.load %arg10[%c0_11, %c0_12] : memref<128x256xf32, #tpu.memory_space<vmem>>, vector<128x256xf32>
      tpu.vector_store %arg10[%c0_11, %c0_12], %12 {strides = array<i32>} : memref<128x256xf32, #tpu.memory_space<vmem>>, vector<128x256xf32>,
    } else {
    }
    %c0 = arith.constant 0 : index
    %c0_1 = arith.constant 0 : index
    %3 = vector.load %arg4[%c0, %c0_1] : memref<256x256xbf16, #tpu.memory_space<vmem>>, vector<256x256xbf16>
    %c0_2 = arith.constant 0 : index
    %c0_3 = arith.constant 0 : index
    %4 = vector.load %arg10[%c0_2, %c0_3] : memref<128x256xf32, #tpu.memory_space<vmem>>, vector<128x256xf32>
    %c0_4 = arith.constant 0 : index
    %c0_5 = arith.constant 0 : index
    %5 = vector.load %arg3[%c0_4, %c0_5] : memref<128x256xbf16, #tpu.memory_space<vmem>>, vector<128x256xbf16>
    %cst = arith.constant dense<0.000000e+00> : vector<128x256xf32>
    %6 = tpu.matmul %5, %3, %cst {dimension_numbers = #tpu.dot_dimension_numbers<[1], [1], [0], [0], [0, 0, 1, 0], [], []>} : vector<128x256xbf16>, vector<256x256xbf16>, vector<128x256xf32> -> vector<128x256xf32>
    %7 = arith.addf %4, %6 : vector<128x256xf32>
    %c0_6 = arith.constant 0 : index
    %c0_7 = arith.constant 0 : index
    %8 = vector.load %arg10[%c0_6, %c0_7] : memref<128x256xf32, #tpu.memory_space<vmem>>, vector<128x256xf32>
    tpu.vector_store %arg10[%c0_6, %c0_7], %7 {strides = array<i32>} : memref<128x256xf32, #tpu.memory_space<vmem>>, vector<128x256xf32>,
    %c0_i32_8 = arith.constant 0 : i32
    %9 = arith.cmpi eq, %arg2, %c0_i32_8 : i32
    %10 = arith.extui %9 : i1 to i32
    %c0_i32_9 = arith.constant 0 : i32
    %11 = arith.cmpi ne, %10, %c0_i32_9 : i32
    scf.if %11 {
      %c0_10 = arith.constant 0 : index
      %c0_11 = arith.constant 0 : index
      %12 = vector.load %arg10[%c0_10, %c0_11] : memref<128x256xf32, #tpu.memory_space<vmem>>, vector<128x256xf32>
      %c0_12 = arith.constant 0 : index
      %c0_13 = arith.constant 0 : index
      %13 = vector.load %arg5[%c0_12, %c0_13] : memref<1x256xf32, #tpu.memory_space<vmem>>, vector<1x256xf32>
      %14 = vector.broadcast %13 : vector<1x256xf32> to vector<128x256xf32>
      %15 = arith.mulf %12, %14 : vector<128x256xf32>
      %c0_14 = arith.constant 0 : index
      %c0_15 = arith.constant 0 : index
      %16 = vector.load %arg6[%c0_14, %c0_15] : memref<128x128xf32, #tpu.memory_space<vmem>>, vector<128x128xf32>
      %c0_16 = arith.constant 0 : index
      %c0_17 = arith.constant 0 : index
      %17 = vector.load %arg7[%c0_16, %c0_17] : memref<256x128xf32, #tpu.memory_space<vmem>>, vector<256x128xf32>
      %cst_18 = arith.constant dense<0.000000e+00> : vector<128x256xf32>
      %18 = tpu.matmul %16, %17, %cst_18 {dimension_numbers = #tpu.dot_dimension_numbers<[1], [1], [0], [0], [0, 0, 1, 0], [], []>} : vector<128x128xf32>, vector<256x128xf32>, vector<128x256xf32> -> vector<128x256xf32>
      %19 = arith.addf %15, %18 : vector<128x256xf32>
      %c0_19 = arith.constant 0 : index
      %c0_20 = arith.constant 0 : index
      %20 = vector.load %arg8[%c0_19, %c0_20] : memref<1x256xf32, #tpu.memory_space<vmem>>, vector<1x256xf32>
      %21 = vector.broadcast %20 : vector<1x256xf32> to vector<128x256xf32>
      %22 = arith.addf %19, %21 : vector<128x256xf32>
      %c0_21 = arith.constant 0 : index
      %c0_22 = arith.constant 0 : index
      %23 = vector.load %arg9[%c0_21, %c0_22] : memref<128x256xf32, #tpu.memory_space<vmem>>, vector<128x256xf32>
      tpu.vector_store %arg9[%c0_21, %c0_22], %22 {strides = array<i32>} : memref<128x256xf32, #tpu.memory_space<vmem>>, vector<128x256xf32>,
    } else {
    }
    return
  }
  func.func @transform_0(%arg0: i32, %arg1: i32, %arg2: i32) -> (i32, i32) {
    %c0_i32 = arith.constant 0 : i32
    return %arg0, %arg2 : i32, i32
  }
  func.func @transform_1(%arg0: i32, %arg1: i32, %arg2: i32) -> (i32, i32) {
    %c0_i32 = arith.constant 0 : i32
    return %arg1, %arg2 : i32, i32
  }
  func.func @transform_2(%arg0: i32, %arg1: i32, %arg2: i32) -> (i32, i32) {
    %c0_i32 = arith.constant 0 : i32
    %c0_i32_0 = arith.constant 0 : i32
    return %c0_i32, %arg1 : i32, i32
  }
  func.func @transform_3(%arg0: i32, %arg1: i32, %arg2: i32) -> (i32, i32) {
    %c0_i32 = arith.constant 0 : i32
    %c0_i32_0 = arith.constant 0 : i32
    return %arg0, %c0_i32 : i32, i32
  }
  func.func @transform_4(%arg0: i32, %arg1: i32, %arg2: i32) -> (i32, i32) {
    %c0_i32 = arith.constant 0 : i32
    %c0_i32_0 = arith.constant 0 : i32
    return %arg1, %c0_i32 : i32, i32
  }
  func.func @transform_5(%arg0: i32, %arg1: i32, %arg2: i32) -> (i32, i32) {
    %c0_i32 = arith.constant 0 : i32
    %c0_i32_0 = arith.constant 0 : i32
    return %c0_i32, %arg1 : i32, i32
  }
  func.func @transform_6(%arg0: i32, %arg1: i32, %arg2: i32) -> (i32, i32) {
    %c0_i32 = arith.constant 0 : i32
    return %arg0, %arg1 : i32, i32
  }
}

</mosaic_0001>

<bundles_post_ra>
// kernel: tpu_custom_call.1
= control target key start
LH: loop header
LB: loop body
LE: loop exit
PB: predicated region body
PF: predicated region fallthrough
CT: control target
= control target key end

     0   :  { %11 = vsyncpa [#allocation4], 0  ;;  %s1778_s0 = inlined_call_operand.hbm [shape: bf16[128,256], index: 0, kind: input, shape index: {}]   ;;  %s1779_s1 = inlined_call_operand.hbm [shape: bf16[256,256], index: 1, kind: input, shape index: {}]   ;;  %s1780_s2 = inlined_call_operand.hbm [shape: f32[1,256], index: 2, kind: input, shape index: {}]   ;;  %s1781_s3 = inlined_call_operand.hbm [shape: f32[128,128], index: 3, kind: input, shape index: {}]   ;;  %s1782_s4 = inlined_call_operand.hbm [shape: f32[256,128], index: 4, kind: input, shape index: {}]   ;;  %s1783_s5 = inlined_call_operand.vmem [shape: f32[1,256], index: 5, kind: input, shape index: {}]   ;;  %s1784_s6 = inlined_call_operand.hbm [shape: f32[128,256], index: 6, kind: output, shape index: {}]  }
   0x1   :  { %12 = vsyncpa [#allocation7], 0 }
   0x2   :  { %13 = vsyncpa [#allocation10], 0 }
   0x3   :  { %14 = vsyncpa [#allocation5], 0  ;;  %s32_s23 = sshll.u32 %s1779_s1, 4  ;;  %s1508_s24 = smov [#allocation6]   ;;  %s33_s23 = int_to_ptr.hbm [resolvable:$true] %s32_s23 }
   0x4   :  { %s34_s25 = sshll.u32 %s1508_s24, 4  ;;  %s56_s28 = sshll.u32 %s1781_s3, 4  ;;  %s35_s25 = int_to_ptr.vmem [resolvable:$true] %s34_s25  ;;  %s57_s28 = int_to_ptr.hbm [resolvable:$true] %s56_s28 }
   0x5   :  { %s1509_s29 = smov 128   ;;  %s1510_s30 = smov 8  }
   0x6   :  { %40 = dma.hbm_to_vmem [thread:$0]  %s33_s23, 4096, %s35_s25, [#allocation7], %s1509_s29, %s1509_s29, %s1510_s30  }
   0x7   :  { %s1511_s7 = smov [#allocation9]   ;;  %s19_s11 = sshll.u32 %s1778_s0, 4  ;;  %s20_s11 = int_to_ptr.hbm [resolvable:$true] %s19_s11 }
   0x8   :  { %s58_s8 = sshll.u32 %s1511_s7, 4  ;;  %s46_s13 = sshll.u32 %s1780_s2, 4  ;;  %s59_s8 = int_to_ptr.vmem [resolvable:$true] %s58_s8  ;;  %s47_s13 = int_to_ptr.hbm [resolvable:$true] %s46_s13 }
   0x9   :  { %64 = dma.hbm_to_vmem [thread:$0]  %s57_s28, 2048, %s59_s8, [#allocation10], %s1509_s29, %s1509_s29, %s1510_s30  }
   0xa   :  { %s1512_s14 = smov [#allocation3]   ;;  %s1513_s3 = smov [#allocation8]  }
   0xb   :  { %s21_s15 = sshll.u32 %s1512_s14, 4  ;;  %s48_s16 = sshll.u32 %s1513_s3, 4  ;;  %s22_s15 = int_to_ptr.vmem [resolvable:$true] %s21_s15  ;;  %s49_s16 = int_to_ptr.vmem [resolvable:$true] %s48_s16 }
   0xc   :  { %27 = dma.hbm_to_vmem [thread:$0]  %s20_s11, 2048, %s22_s15, [#allocation4], %s1509_s29, %s1509_s29, %s1510_s30  }
   0xd   :  { %s69_s19 = sshll.u32 %s1782_s4, 4  ;;  %s1514_s0 = smov [#allocation11]   ;;  %s70_s19 = int_to_ptr.hbm [resolvable:$true] %s69_s19 }
   0xe   :  { %51 = dma.hbm_to_vmem [thread:$0]  %s47_s13, 32, %s49_s16, [#allocation7]  }
   0xf   :  { %s71_s20 = sshll.u32 %s1514_s0, 4  ;;  %s72_s20 = int_to_ptr.vmem [resolvable:$true] %s71_s20 }
  0x10   :  { %77 = dma.hbm_to_vmem [thread:$0]  %s70_s19, 4096, %s72_s20, [#allocation10], %s1509_s29, %s1509_s29, %s1510_s30  }
  0x11   :  { %1500 = dma.done.wait [#allocation4], 2048  }
  0x12   :  { %1501 = vsyncadd [#allocation4], 4294965248 }
  0x13   :  { %1502 = dma.done.wait [#allocation7], 4128  }
  0x14   :  { %1503 = vsyncadd [#allocation7], 4294963168 }
  0x15   :  { %1504 = dma.done.wait [#allocation10], 6144  }
  0x16   :  { %1505 = vsyncadd [#allocation10], 4294961152  ;;  %v1212_v0 = vld [vmem:[#allocation6 + $0x70] sm:$0xf]  ;;  %v1297_v1 = vld [vmem:[#allocation6 + $0x74] sm:$0xf0] }
  0x17   :  { %v1296_v2 = vld [vmem:[#allocation6 + $0x74] sm:$0xf]  ;;  %v1213_v3 = vor.u32 %v1297_v1, %v1212_v0  ;;  %v1214_v4 = vld [vmem:[#allocation6 + $0x78] sm:$0xf0]  ;;  %v1204_v6 = vld [vmem:[#allocation6 + $0x60] sm:$0xf] }
  0x18   :  { %v1217_v5 = vor.u32 %v1296_v2, %v1214_v4  ;;  %v1295_v7 = vld [vmem:[#allocation6 + $0x64] sm:$0xf0]  ;;  %v1294_v8 = vld [vmem:[#allocation6 + $0x64] sm:$0xf]  ;;  %v1206_v9 = vld [vmem:[#allocation6 + $0x68] sm:$0xf0] }
  0x19   :  { %456 = vmatpush.bf16.xpose.msra.mxu0 %v1213_v3  ;;  %1330 = vmatpush.bf16.xpose.msra.mxu2 %v1213_v3  ;;  %v1205_v10 = vor.u32 %v1295_v7, %v1204_v6  ;;  %v1209_v11 = vor.u32 %v1294_v8, %v1206_v9  ;;  %v1196_v12 = vld [vmem:[#allocation6 + $0x50] sm:$0xf]  ;;  %v1293_v13 = vld [vmem:[#allocation6 + $0x54] sm:$0xf0]  ;;  %v1292_v14 = vld [vmem:[#allocation6 + $0x54] sm:$0xf] }
  0x1a   :  { %1338 = vmatpush.bf16.xpose.msra.mxu3 %v1217_v5  ;;  %505 = vmatpush.bf16.xpose.msra.mxu1 %v1217_v5  ;;  %v1198_v15 = vld [vmem:[#allocation6 + $0x58] sm:$0xf0]  ;;  %v1197_v16 = vor.u32 %v1293_v13, %v1196_v12  ;;  %v1188_v18 = vld [vmem:[#allocation6 + $0x40] sm:$0xf]  ;;  %v1291_v19 = vld [vmem:[#allocation6 + $0x44] sm:$0xf0] }
  0x1b   :  { %v1201_v17 = vor.u32 %v1292_v14, %v1198_v15  ;;  %v1290_v20 = vld [vmem:[#allocation6 + $0x44] sm:$0xf]  ;;  %v1190_v21 = vld [vmem:[#allocation6 + $0x48] sm:$0xf0]  ;;  %v1189_v22 = vor.u32 %v1291_v19, %v1188_v18  ;;  %v1180_v24 = vld [vmem:[#allocation6 + $0x30] sm:$0xf] }
  0x1c   :  { %v1193_v23 = vor.u32 %v1290_v20, %v1190_v21  ;;  %v1289_v25 = vld [vmem:[#allocation6 + $0x34] sm:$0xf0]  ;;  %v1288_v26 = vld [vmem:[#allocation6 + $0x34] sm:$0xf]  ;;  %v1182_v27 = vld [vmem:[#allocation6 + $0x38] sm:$0xf0] }
  0x1d   :  { %v1181_v28 = vor.u32 %v1289_v25, %v1180_v24  ;;  %v1185_v29 = vor.u32 %v1288_v26, %v1182_v27  ;;  %v1172_v30 = vld [vmem:[#allocation6 + $0x20] sm:$0xf]  ;;  %v1287_v31 = vld [vmem:[#allocation6 + $0x24] sm:$0xf0]  ;;  %v1286_v32 = vld [vmem:[#allocation6 + $0x24] sm:$0xf] }
  0x1e   :  { %v1174_v33 = vld [vmem:[#allocation6 + $0x28] sm:$0xf0]  ;;  %v1173_v34 = vor.u32 %v1287_v31, %v1172_v30  ;;  %v1164_v36 = vld [vmem:[#allocation6 + $0x10] sm:$0xf]  ;;  %v1285_v37 = vld [vmem:[#allocation6 + $0x14] sm:$0xf0] }
  0x1f   :  { %v1177_v35 = vor.u32 %v1286_v32, %v1174_v33  ;;  %v1284_v38 = vld [vmem:[#allocation6 + $0x14] sm:$0xf]  ;;  %v1166_v39 = vld [vmem:[#allocation6 + $0x18] sm:$0xf0]  ;;  %v1165_v40 = vor.u32 %v1285_v37, %v1164_v36  ;;  %v1156_v42 = vld [vmem:[#allocation6] sm:$0xf] }
  0x20   :  { %v1169_v41 = vor.u32 %v1284_v38, %v1166_v39  ;;  %v1283_v43 = vld [vmem:[#allocation6 + $0x4] sm:$0xf0]  ;;  %v1282_v44 = vld [vmem:[#allocation6 + $0x4] sm:$0xf]  ;;  %v1158_v45 = vld [vmem:[#allocation6 + $0x8] sm:$0xf0] }
  0x21   :  { %457 = vmatpush.bf16.xpose.msra.mxu0 %v1205_v10  ;;  %1331 = vmatpush.bf16.xpose.msra.mxu2 %v1205_v10  ;;  %v1276_v46 = vld [vmem:[#allocation6 + $0xf0] sm:$0xf]  ;;  %v1313_v47 = vld [vmem:[#allocation6 + $0xf4] sm:$0xf0]  ;;  %v1312_v48 = vld [vmem:[#allocation6 + $0xf4] sm:$0xf]  ;;  %v1157_v50 = vor.u32 %v1283_v43, %v1156_v42  ;;  %v1161_v51 = vor.u32 %v1282_v44, %v1158_v45 }
  0x22   :  { %1339 = vmatpush.bf16.xpose.msra.mxu3 %v1209_v11  ;;  %506 = vmatpush.bf16.xpose.msra.mxu1 %v1209_v11  ;;  %v1278_v49 = vld [vmem:[#allocation6 + $0xf8] sm:$0xf0]  ;;  %v1092_v52 = vld [vmem:[#allocation3] sm:$0xf]  ;;  %v1277_v53 = vor.u32 %v1313_v47, %v1276_v46  ;;  %v1315_v55 = vld [vmem:[#allocation3 + $0x4] sm:$0xf0] }
  0x23   :  { %v1281_v54 = vor.u32 %v1312_v48, %v1278_v49  ;;  %v1124_v56 = vld [vmem:[#allocation3 + $0x40] sm:$0xf]  ;;  %v1323_v57 = vld [vmem:[#allocation3 + $0x44] sm:$0xf0]  ;;  %v1322_v58 = vld [vmem:[#allocation3 + $0x44] sm:$0xf]  ;;  %v1568_v1 = vor.u32 %v1315_v55, %v1092_v52 }
  0x24   :  { %v820_v59 = vld [vmem:[#allocation11 + $0x78] sm:$0xff]  ;;  %v1126_v61 = vld [vmem:[#allocation3 + $0x48] sm:$0xf0]  ;;  %v1314_v62 = vld [vmem:[#allocation3 + $0x4] sm:$0xf]  ;;  %v1570_v2 = vor.u32 %v1323_v57, %v1124_v56  ;;  %s1075_s24 = sshll.u32 %s1784_s6, 4  ;;  %s1076_s24 = int_to_ptr.hbm [resolvable:$true] %s1075_s24 }
  0x25   :  { %v836_v60 = vld [vmem:[#allocation11 + $0xf8] sm:$0xff]  ;;  %v1094_v63 = vld [vmem:[#allocation3 + $0x8] sm:$0xf0]  ;;  %v1311_v3 = vld [vmem:[#allocation6 + $0xe4] sm:$0xf0]  ;;  %v1572_v6 = vor.u32 %v1322_v58, %v1126_v61  ;;  %s1516_s25 = smov 256  }
  0x26   :  { %v1268_v0 = vld [vmem:[#allocation6 + $0xe0] sm:$0xf]  ;;  %v1310_v4 = vld [vmem:[#allocation6 + $0xe4] sm:$0xf]  ;;  %v1270_v5 = vld [vmem:[#allocation6 + $0xe8] sm:$0xf0]  ;;  %v1574_v7 = vor.u32 %v1314_v62, %v1094_v63 }
  0x27   :  { %v819_v8 = vld [vmem:[#allocation11 + $0x70] sm:$0xff]  ;;  %v1269_v9 = vor.u32 %v1311_v3, %v1268_v0  ;;  %v1273_v10 = vor.u32 %v1310_v4, %v1270_v5  ;;  %v818_v12 = vld [vmem:[#allocation11 + $0x68] sm:$0xff]  ;;  %v817_v18 = vld [vmem:[#allocation11 + $0x60] sm:$0xff]  ;;  %s1517_s26 = smov 16  }
  0x28   :  { %v835_v11 = vld [vmem:[#allocation11 + $0xf0] sm:$0xff]  ;;  %v834_v14 = vld [vmem:[#allocation11 + $0xe8] sm:$0xff]  ;;  %v833_v21 = vld [vmem:[#allocation11 + $0xe0] sm:$0xff] }
  0x29   :  { %458 = vmatpush.bf16.xpose.msra.mxu0 %v1197_v16  ;;  %1332 = vmatpush.bf16.xpose.msra.mxu2 %v1197_v16  ;;  %v1260_v13 = vld [vmem:[#allocation6 + $0xd0] sm:$0xf]  ;;  %v1309_v15 = vld [vmem:[#allocation6 + $0xd4] sm:$0xf0]  ;;  %v1308_v16 = vld [vmem:[#allocation6 + $0xd4] sm:$0xf] }
  0x2a   :  { %1340 = vmatpush.bf16.xpose.msra.mxu3 %v1201_v17  ;;  %507 = vmatpush.bf16.xpose.msra.mxu1 %v1201_v17  ;;  %v1262_v17 = vld [vmem:[#allocation6 + $0xd8] sm:$0xf0]  ;;  %v1261_v19 = vor.u32 %v1309_v15, %v1260_v13  ;;  %v1132_v24 = vld [vmem:[#allocation3 + $0x50] sm:$0xf]  ;;  %v1325_v25 = vld [vmem:[#allocation3 + $0x54] sm:$0xf0] }
  0x2b   :  { %v1265_v20 = vor.u32 %v1308_v16, %v1262_v17  ;;  %v1324_v26 = vld [vmem:[#allocation3 + $0x54] sm:$0xf]  ;;  %v1134_v27 = vld [vmem:[#allocation3 + $0x58] sm:$0xf0]  ;;  %v1252_v31 = vld [vmem:[#allocation6 + $0xc0] sm:$0xf] }
  0x2c   :  { %v816_v30 = vld [vmem:[#allocation11 + $0x58] sm:$0xff]  ;;  %v1306_v36 = vld [vmem:[#allocation6 + $0xc4] sm:$0xf]  ;;  %v1254_v37 = vld [vmem:[#allocation6 + $0xc8] sm:$0xf0]  ;;  %v1584_v38 = vor.u32 %v1324_v26, %v1134_v27 }
  0x2d   :  { %v832_v32 = vld [vmem:[#allocation11 + $0xd8] sm:$0xff]  ;;  %v1257_v42 = vor.u32 %v1306_v36, %v1254_v37  ;;  %v831_v43 = vld [vmem:[#allocation11 + $0xd0] sm:$0xff]  ;;  %v814_v44 = vld [vmem:[#allocation11 + $0x48] sm:$0xff] }
  0x2e   :  { %v1244_v45 = vld [vmem:[#allocation6 + $0xb0] sm:$0xf]  ;;  %v1305_v47 = vld [vmem:[#allocation6 + $0xb4] sm:$0xf0]  ;;  %v1304_v48 = vld [vmem:[#allocation6 + $0xb4] sm:$0xf] }
  0x2f   :  { %v830_v46 = vld [vmem:[#allocation11 + $0xc8] sm:$0xff]  ;;  %v1246_v49 = vld [vmem:[#allocation6 + $0xb8] sm:$0xf0]  ;;  %v1140_v56 = vld [vmem:[#allocation3 + $0x60] sm:$0xf] }
  0x30   :  { %v1249_v52 = vor.u32 %v1304_v48, %v1246_v49  ;;  %v1319_v55 = vld [vmem:[#allocation3 + $0x24] sm:$0xf0]  ;;  %v1326_v58 = vld [vmem:[#allocation3 + $0x64] sm:$0xf]  ;;  %v1110_v61 = vld [vmem:[#allocation3 + $0x28] sm:$0xf0] }
  0x31   :  { %459 = vmatpush.bf16.xpose.msra.mxu0 %v1189_v22  ;;  %1333 = vmatpush.bf16.xpose.msra.mxu2 %v1189_v22  ;;  %v1100_v22 = vld [vmem:[#allocation3 + $0x10] sm:$0xf]  ;;  %v1327_v57 = vld [vmem:[#allocation3 + $0x64] sm:$0xf0]  ;;  %v812_v62 = vld [vmem:[#allocation11 + $0x38] sm:$0xff] }
  0x32   :  { %1341 = vmatpush.bf16.xpose.msra.mxu3 %v1193_v23  ;;  %508 = vmatpush.bf16.xpose.msra.mxu1 %v1193_v23  ;;  %v1317_v23 = vld [vmem:[#allocation3 + $0x14] sm:$0xf0]  ;;  %v1236_v63 = vld [vmem:[#allocation6 + $0xa0] sm:$0xf]  ;;  %v1594_v4 = vor.u32 %v1327_v57, %v1140_v56  ;;  %v1303_v5 = vld [vmem:[#allocation6 + $0xa4] sm:$0xf0] }
  0x33   :  { %v1580_v33 = vor.u32 %v1317_v23, %v1100_v22  ;;  %v828_v0 = vld [vmem:[#allocation11 + $0xb8] sm:$0xff]  ;;  %v1237_v13 = vor.u32 %v1303_v5, %v1236_v63  ;;  %v827_v15 = vld [vmem:[#allocation11 + $0xb0] sm:$0xff]  ;;  %v810_v16 = vld [vmem:[#allocation11 + $0x28] sm:$0xff] }
  0x34   :  { %v1228_v17 = vld [vmem:[#allocation6 + $0x90] sm:$0xf]  ;;  %v809_v22 = vld [vmem:[#allocation11 + $0x20] sm:$0xff]  ;;  %v1321_v27 = vld [vmem:[#allocation3 + $0x34] sm:$0xf0] }
  0x35   :  { %v1116_v26 = vld [vmem:[#allocation3 + $0x30] sm:$0xf]  ;;  %v808_v36 = vld [vmem:[#allocation11 + $0x18] sm:$0xff]  ;;  %v789_v56 = vld [vmem:[#allocation9] sm:$0xff] }
  0x36   :  { %v1220_v37 = vld [vmem:[#allocation6 + $0x80] sm:$0xf]  ;;  %v807_v48 = vld [vmem:[#allocation11 + $0x10] sm:$0xff]  ;;  %v790_v57 = vld [vmem:[#allocation9 + $0x8] sm:$0xff] }
  0x37   :  { %v1621_v63 = vld [vmem:[#allocation8] sm:$0x3] }
  0x39   :  { %460 = vmatpush.bf16.xpose.msra.mxu0 %v1181_v28  ;;  %1334 = vmatpush.bf16.xpose.msra.mxu2 %v1181_v28  ;;  %v1316_v28 = vld [vmem:[#allocation3 + $0x14] sm:$0xf] }
  0x3a   :  { %1342 = vmatpush.bf16.xpose.msra.mxu3 %v1185_v29  ;;  %509 = vmatpush.bf16.xpose.msra.mxu1 %v1185_v29  ;;  %v1102_v29 = vld [vmem:[#allocation3 + $0x18] sm:$0xf0] }
  0x3b   :  { %v1586_v39 = vor.u32 %v1316_v28, %v1102_v29  ;;  %v1148_v28 = vld [vmem:[#allocation3 + $0x70] sm:$0xf]  ;;  %v1329_v29 = vld [vmem:[#allocation3 + $0x74] sm:$0xf0] }
  0x41   :  { %461 = vmatpush.bf16.xpose.msra.mxu0 %v1173_v34  ;;  %1335 = vmatpush.bf16.xpose.msra.mxu2 %v1173_v34  ;;  %v1582_v34 = vor.u32 %v1325_v25, %v1132_v24  ;;  %v825_v25 = vld [vmem:[#allocation11 + $0xa0] sm:$0xff] }
  0x42   :  { %1343 = vmatpush.bf16.xpose.msra.mxu3 %v1177_v35  ;;  %510 = vmatpush.bf16.xpose.msra.mxu1 %v1177_v35  ;;  %v1307_v35 = vld [vmem:[#allocation6 + $0xc4] sm:$0xf0] }
  0x49   :  { %462 = vmatpush.bf16.xpose.msra.mxu0 %v1165_v40  ;;  %1336 = vmatpush.bf16.xpose.msra.mxu2 %v1165_v40  ;;  %v815_v40 = vld [vmem:[#allocation11 + $0x50] sm:$0xff] }
  0x4a   :  { %1344 = vmatpush.bf16.xpose.msra.mxu3 %v1169_v41  ;;  %511 = vmatpush.bf16.xpose.msra.mxu1 %v1169_v41  ;;  %v1253_v41 = vor.u32 %v1307_v35, %v1252_v31  ;;  %v1150_v31 = vld [vmem:[#allocation3 + $0x78] sm:$0xf0] }
  0x4b   :  { %v1118_v35 = vld [vmem:[#allocation3 + $0x38] sm:$0xf0] }
  0x51   :  { %463 = vmatpush.bf16.xpose.msra.mxu0 %v1157_v50  ;;  %1337 = vmatpush.bf16.xpose.msra.mxu2 %v1157_v50  ;;  %v813_v50 = vld [vmem:[#allocation11 + $0x40] sm:$0xff] }
  0x52   :  { %1345 = vmatpush.bf16.xpose.msra.mxu3 %v1161_v51  ;;  %512 = vmatpush.bf16.xpose.msra.mxu1 %v1161_v51  ;;  %v1245_v51 = vor.u32 %v1305_v47, %v1244_v45  ;;  %v1222_v45 = vld [vmem:[#allocation6 + $0x88] sm:$0xf0] }
  0x58   :  { %464 = vmatmul.bf16.vlgmr.msra.gmra.mxu0 %v1568_v1  ;;  %484 = vmatmul.bf16.vlgmr.msra.gmra.mxu2 %v1570_v2 }
  0x59   :  { %554 = vmatpush.bf16.xpose.msrb.mxu2 %v1277_v53  ;;  %837 = vmatpush.xpose.msrb.mxu0 %v820_v59  ;;  %v829_v53 = vld [vmem:[#allocation11 + $0xc0] sm:$0xff]  ;;  %v1142_v59 = vld [vmem:[#allocation3 + $0x68] sm:$0xf0] }
  0x5a   :  { %603 = vmatpush.bf16.xpose.msrb.mxu3 %v1281_v54  ;;  %902 = vmatpush.xpose.msrb.mxu1 %v836_v60  ;;  %v1108_v54 = vld [vmem:[#allocation3 + $0x20] sm:$0xf]  ;;  %v1318_v60 = vld [vmem:[#allocation3 + $0x24] sm:$0xf] }
  0x5b   :  { %533 = vmatmul.bf16.vlgmr.msra.gmra.mxu3 %v1572_v6  ;;  %513 = vmatmul.bf16.vlgmr.msra.gmra.mxu1 %v1574_v7  ;;  %v1592_v3 = vor.u32 %v1319_v55, %v1108_v54  ;;  %v805_v54 = vld [vmem:[#allocation11] sm:$0xff] }
  0x5c   :  { %v821_v55 = vld [vmem:[#allocation11 + $0x80] sm:$0xff] }
  0x5d   :  { %838 = vmatpush.xpose.msrb.mxu0 %v819_v8  ;;  %v1302_v8 = vld [vmem:[#allocation6 + $0xa4] sm:$0xf] }
  0x5e   :  { %903 = vmatpush.xpose.msrb.mxu1 %v835_v11  ;;  %v1598_v11 = vor.u32 %v1318_v60, %v1110_v61  ;;  %v793_v60 = vld [vmem:[#allocation9 + $0x20] sm:$0xff] }
  0x5f   :  { %v797_v61 = vld [vmem:[#allocation9 + $0x40] sm:$0xff] }
  0x61   :  { %555 = vmatpush.bf16.xpose.msrb.mxu2 %v1269_v9  ;;  %839 = vmatpush.xpose.msrb.mxu0 %v818_v12  ;;  %v1238_v9 = vld [vmem:[#allocation6 + $0xa8] sm:$0xf0]  ;;  %v811_v12 = vld [vmem:[#allocation11 + $0x30] sm:$0xff] }
  0x62   :  { %604 = vmatpush.bf16.xpose.msrb.mxu3 %v1273_v10  ;;  %904 = vmatpush.xpose.msrb.mxu1 %v834_v14  ;;  %v1596_v10 = vor.u32 %v1326_v58, %v1142_v59  ;;  %v1241_v14 = vor.u32 %v1302_v8, %v1238_v9  ;;  %v791_v58 = vld [vmem:[#allocation9 + $0x10] sm:$0xff]  ;;  %v792_v59 = vld [vmem:[#allocation9 + $0x18] sm:$0xff] }
  0x65   :  { %840 = vmatpush.xpose.msrb.mxu0 %v817_v18  ;;  %v826_v18 = vld [vmem:[#allocation11 + $0xa8] sm:$0xff] }
  0x66   :  { %905 = vmatpush.xpose.msrb.mxu1 %v833_v21  ;;  %v1230_v21 = vld [vmem:[#allocation6 + $0x98] sm:$0xf0] }
  0x68   :  { %469 = vmatmul.bf16.gmra.mxu0 %v1580_v33  ;;  %489 = vmatmul.bf16.gmra.mxu2 %v1582_v34 }
  0x69   :  { %556 = vmatpush.bf16.xpose.msrb.mxu2 %v1261_v19  ;;  %841 = vmatpush.xpose.msrb.mxu0 %v816_v30  ;;  %v1301_v19 = vld [vmem:[#allocation6 + $0x94] sm:$0xf0]  ;;  %v1328_v30 = vld [vmem:[#allocation3 + $0x74] sm:$0xf] }
  0x6a   :  { %605 = vmatpush.bf16.xpose.msrb.mxu3 %v1265_v20  ;;  %906 = vmatpush.xpose.msrb.mxu1 %v832_v32  ;;  %v1300_v20 = vld [vmem:[#allocation6 + $0x94] sm:$0xf]  ;;  %v1229_v23 = vor.u32 %v1301_v19, %v1228_v17 }
  0x6b   :  { %538 = vmatmul.bf16.gmra.mxu3 %v1584_v38  ;;  %518 = vmatmul.bf16.gmra.mxu1 %v1586_v39  ;;  %v1233_v24 = vor.u32 %v1300_v20, %v1230_v21  ;;  %v1320_v32 = vld [vmem:[#allocation3 + $0x34] sm:$0xf] }
  0x6c   :  { %v1121_v47 = vor.u32 %v1320_v32, %v1118_v35 }
  0x6d   :  { %842 = vmatpush.xpose.msrb.mxu0 %v815_v40  ;;  %v824_v40 = vld [vmem:[#allocation11 + $0x98] sm:$0xff] }
  0x6e   :  { %907 = vmatpush.xpose.msrb.mxu1 %v831_v43  ;;  %v1299_v43 = vld [vmem:[#allocation6 + $0x84] sm:$0xf0] }
  0x6f   :  { %v1221_v49 = vor.u32 %v1299_v43, %v1220_v37  ;;  %v802_v37 = vld [vmem:[#allocation9 + $0x68] sm:$0xff] }
  0x71   :  { %557 = vmatpush.bf16.xpose.msrb.mxu2 %v1253_v41  ;;  %843 = vmatpush.xpose.msrb.mxu0 %v814_v44  ;;  %v1117_v41 = vor.u32 %v1321_v27, %v1116_v26  ;;  %v1298_v44 = vld [vmem:[#allocation6 + $0x84] sm:$0xf] }
  0x72   :  { %606 = vmatpush.bf16.xpose.msrb.mxu3 %v1257_v42  ;;  %908 = vmatpush.xpose.msrb.mxu1 %v830_v46  ;;  %v1604_v42 = vor.u32 %v1329_v29, %v1148_v28  ;;  %v1606_v46 = vor.u32 %v1328_v30, %v1150_v31 }
  0x75   :  { %844 = vmatpush.xpose.msrb.mxu0 %v813_v50  ;;  %v1225_v50 = vor.u32 %v1298_v44, %v1222_v45 }
  0x76   :  { %909 = vmatpush.xpose.msrb.mxu1 %v829_v53  ;;  %v822_v53 = vld [vmem:[#allocation11 + $0x88] sm:$0xff] }
  0x78   :  { %474 = vmatmul.bf16.gmra.mxu0 %v1592_v3  ;;  %494 = vmatmul.bf16.gmra.mxu2 %v1594_v4 }
  0x79   :  { %558 = vmatpush.bf16.xpose.msrb.mxu2 %v1245_v51  ;;  %845 = vmatpush.xpose.msrb.mxu0 %v812_v62  ;;  %v823_v51 = vld [vmem:[#allocation11 + $0x90] sm:$0xff] }
  0x7a   :  { %607 = vmatpush.bf16.xpose.msrb.mxu3 %v1249_v52  ;;  %910 = vmatpush.xpose.msrb.mxu1 %v828_v0  ;;  %v806_v52 = vld [vmem:[#allocation11 + $0x8] sm:$0xff] }
  0x7b   :  { %543 = vmatmul.bf16.gmra.mxu3 %v1596_v10  ;;  %523 = vmatmul.bf16.gmra.mxu1 %v1598_v11 }
  0x7d   :  { %846 = vmatpush.xpose.msrb.mxu0 %v811_v12 }
  0x7e   :  { %911 = vmatpush.xpose.msrb.mxu1 %v827_v15 }
  0x81   :  { %559 = vmatpush.bf16.xpose.msrb.mxu2 %v1237_v13  ;;  %847 = vmatpush.xpose.msrb.mxu0 %v810_v16  ;;  %v799_v16 = vld [vmem:[#allocation9 + $0x50] sm:$0xff] }
  0x82   :  { %608 = vmatpush.bf16.xpose.msrb.mxu3 %v1241_v14  ;;  %912 = vmatpush.xpose.msrb.mxu1 %v826_v18 }
  0x85   :  { %848 = vmatpush.xpose.msrb.mxu0 %v809_v22 }
  0x86   :  { %913 = vmatpush.xpose.msrb.mxu1 %v825_v25 }
  0x88   :  { %479 = vmatmul.bf16.gmra.mxu0 %v1117_v41  ;;  %499 = vmatmul.bf16.gmra.mxu2 %v1604_v42 }
  0x89   :  { %560 = vmatpush.bf16.xpose.msrb.mxu2 %v1229_v23  ;;  %849 = vmatpush.xpose.msrb.mxu0 %v808_v36  ;;  %v800_v23 = vld [vmem:[#allocation9 + $0x58] sm:$0xff] }
  0x8a   :  { %609 = vmatpush.bf16.xpose.msrb.mxu3 %v1233_v24  ;;  %914 = vmatpush.xpose.msrb.mxu1 %v824_v40 }
  0x8b   :  { %548 = vmatmul.bf16.gmra.mxu3 %v1606_v46  ;;  %528 = vmatmul.bf16.gmra.mxu1 %v1121_v47 }
  0x8d   :  { %850 = vmatpush.xpose.msrb.mxu0 %v807_v48 }
  0x8e   :  { %915 = vmatpush.xpose.msrb.mxu1 %v823_v51 }
  0x91   :  { %561 = vmatpush.bf16.xpose.msrb.mxu2 %v1221_v49  ;;  %851 = vmatpush.xpose.msrb.mxu0 %v806_v52 }
  0x92   :  { %610 = vmatpush.bf16.xpose.msrb.mxu3 %v1225_v50  ;;  %916 = vmatpush.xpose.msrb.mxu1 %v822_v53  ;;  %v804_v53 = vld [vmem:[#allocation9 + $0x78] sm:$0xff] }
  0x95   :  { %852 = vmatpush.xpose.msrb.mxu0 %v805_v54 }
  0x96   :  { %917 = vmatpush.xpose.msrb.mxu1 %v821_v55 }
  0x98   :  { %562 = vmatmul.bf16.vlgmr.msrb.gmra.mxu2 %v1568_v1  ;;  %853 = vmatmul.f32.vlgmr.msrb.gmra.mxu0 %v789_v56  ;;  %v794_v1 = vld [vmem:[#allocation9 + $0x28] sm:$0xff] }
  0x9b   :  { %611 = vmatmul.bf16.vlgmr.msrb.gmra.mxu3 %v1574_v7  ;;  %918 = vmatmul.f32.vlgmr.msrb.gmra.mxu1 %v789_v56  ;;  %v795_v7 = vld [vmem:[#allocation9 + $0x30] sm:$0xff] }
  0xa0   :  { %856 = vmatmul.f32.gmra.mxu0 %v790_v57 }
  0xa3   :  { %921 = vmatmul.f32.gmra.mxu1 %v790_v57 }
  0xa8   :  { %567 = vmatmul.bf16.gmra.mxu2 %v1580_v33  ;;  %859 = vmatmul.f32.gmra.mxu0 %v791_v58  ;;  %v796_v33 = vld [vmem:[#allocation9 + $0x38] sm:$0xff] }
  0xab   :  { %616 = vmatmul.bf16.gmra.mxu3 %v1586_v39  ;;  %924 = vmatmul.f32.gmra.mxu1 %v791_v58 }
  0xb0   :  { %862 = vmatmul.f32.gmra.mxu0 %v792_v59 }
  0xb3   :  { %927 = vmatmul.f32.gmra.mxu1 %v792_v59 }
  0xb8   :  { %572 = vmatmul.bf16.gmra.mxu2 %v1592_v3  ;;  %865 = vmatmul.f32.gmra.mxu0 %v793_v60  ;;  %v1625_v3 = vperm.slane %v1621_v63, 0 }
  0xbb   :  { %621 = vmatmul.bf16.gmra.mxu3 %v1598_v11  ;;  %930 = vmatmul.f32.gmra.mxu1 %v793_v60  ;;  %v798_v11 = vld [vmem:[#allocation9 + $0x48] sm:$0xff] }
  0xc0   :  { %868 = vmatmul.f32.gmra.mxu0 %v794_v1 }
  0xc3   :  { %933 = vmatmul.f32.gmra.mxu1 %v794_v1 }
  0xc8   :  { %577 = vmatmul.bf16.gmra.mxu2 %v1117_v41  ;;  %871 = vmatmul.f32.gmra.mxu0 %v795_v7 }
  0xcb   :  { %626 = vmatmul.bf16.gmra.mxu3 %v1121_v47  ;;  %936 = vmatmul.f32.gmra.mxu1 %v795_v7 }
  0xd0   :  { %874 = vmatmul.f32.gmra.mxu0 %v796_v33 }
  0xd3   :  { %939 = vmatmul.f32.gmra.mxu1 %v796_v33 }
  0xd5   :  { %v1616_v39 = vpop.f32.mrf.mxu0 }
  0xd8   :  { %v1618_v62 = vpop.f32.mrf.mxu1  ;;  %582 = vmatmul.bf16.gmra.mxu2 %v1570_v2  ;;  %877 = vmatmul.f32.gmra.mxu0 %v797_v61 }
  0xd9   :  { %v515_v56 = vadd.f32 %v1618_v62, %v1616_v39 }
  0xdb   :  { %631 = vmatmul.bf16.gmra.mxu3 %v1572_v6  ;;  %942 = vmatmul.f32.gmra.mxu1 %v797_v61  ;;  %v485_v0 = vpop.f32.mrf.mxu2  ;;  %v757_v58 = vmul.f32 %v1625_v3, %v515_v56 }
  0xdd   :  { %v1627_v9 = vpop.f32.mrf.mxu0 }
  0xde   :  { %v534_v5 = vpop.f32.mrf.mxu3 }
  0xdf   :  { %v535_v8 = vadd.f32 %v534_v5, %v485_v0  ;;  %v1697_v5 = vperm.slane %v1621_v63, 1 }
  0xe0   :  { %v1629_v12 = vpop.f32.mrf.mxu1  ;;  %880 = vmatmul.f32.gmra.mxu0 %v798_v11 }
  0xe1   :  { %v1632_v13 = vmul.f32 %v1625_v3, %v535_v8  ;;  %v517_v39 = vadd.f32 %v1629_v12, %v1627_v9 }
  0xe3   :  { %945 = vmatmul.f32.gmra.mxu1 %v798_v11  ;;  %v487_v2 = vpop.f32.mrf.mxu2  ;;  %v759_v11 = vmul.f32 %v1625_v3, %v517_v39 }
  0xe5   :  { %v1634_v15 = vpop.f32.mrf.mxu0 }
  0xe6   :  { %v536_v14 = vpop.f32.mrf.mxu3 }
  0xe7   :  { %v537_v6 = vadd.f32 %v536_v14, %v487_v2 }
  0xe8   :  { %v1636_v17 = vpop.f32.mrf.mxu1  ;;  %587 = vmatmul.bf16.gmra.mxu2 %v1582_v34  ;;  %883 = vmatmul.f32.gmra.mxu0 %v799_v16 }
  0xe9   :  { %v1639_v18 = vmul.f32 %v1625_v3, %v537_v6  ;;  %v520_v9 = vadd.f32 %v1636_v17, %v1634_v15 }
  0xeb   :  { %636 = vmatmul.bf16.gmra.mxu3 %v1584_v38  ;;  %948 = vmatmul.f32.gmra.mxu1 %v799_v16  ;;  %v490_v19 = vpop.f32.mrf.mxu2  ;;  %v801_v38 = vld [vmem:[#allocation9 + $0x60] sm:$0xff] }
  0xed   :  { %v1643_v22 = vpop.f32.mrf.mxu0 }
  0xee   :  { %v539_v20 = vpop.f32.mrf.mxu3 }
  0xef   :  { %v540_v21 = vadd.f32 %v539_v20, %v490_v19 }
  0xf0   :  { %v1645_v24 = vpop.f32.mrf.mxu1  ;;  %886 = vmatmul.f32.gmra.mxu0 %v800_v23 }
  0xf1   :  { %v1648_v25 = vmul.f32 %v1625_v3, %v540_v21  ;;  %v522_v15 = vadd.f32 %v1645_v24, %v1643_v22 }
  0xf3   :  { %951 = vmatmul.f32.gmra.mxu1 %v800_v23  ;;  %v492_v26 = vpop.f32.mrf.mxu2 }
  0xf5   :  { %v1650_v28 = vpop.f32.mrf.mxu0 }
  0xf6   :  { %v541_v27 = vpop.f32.mrf.mxu3 }
  0xf7   :  { %v542_v34 = vadd.f32 %v541_v27, %v492_v26  ;;  %v761_v27 = vmul.f32 %v1625_v3, %v520_v9 }
  0xf8   :  { %v1652_v29 = vpop.f32.mrf.mxu1  ;;  %592 = vmatmul.bf16.gmra.mxu2 %v1594_v4  ;;  %889 = vmatmul.f32.gmra.mxu0 %v801_v38 }
  0xf9   :  { %v1655_v30 = vmul.f32 %v1625_v3, %v542_v34  ;;  %v525_v22 = vadd.f32 %v1652_v29, %v1650_v28 }
  0xfb   :  { %641 = vmatmul.bf16.gmra.mxu3 %v1596_v10  ;;  %954 = vmatmul.f32.gmra.mxu1 %v801_v38  ;;  %v495_v31 = vpop.f32.mrf.mxu2  ;;  %v803_v10 = vld [vmem:[#allocation9 + $0x70] sm:$0xff] }
  0xfd   :  { %v1659_v36 = vpop.f32.mrf.mxu0 }
  0xfe   :  { %v544_v32 = vpop.f32.mrf.mxu3 }
  0xff   :  { %v545_v35 = vadd.f32 %v544_v32, %v495_v31 }
 0x100   :  { %v1661_v40 = vpop.f32.mrf.mxu1  ;;  %892 = vmatmul.f32.gmra.mxu0 %v802_v37 }
 0x101   :  { %v1664_v41 = vmul.f32 %v1625_v3, %v545_v35  ;;  %v527_v28 = vadd.f32 %v1661_v40, %v1659_v36 }
 0x103   :  { %957 = vmatmul.f32.gmra.mxu1 %v802_v37  ;;  %v497_v43 = vpop.f32.mrf.mxu2 }
 0x105   :  { %v1666_v45 = vpop.f32.mrf.mxu0 }
 0x106   :  { %v546_v44 = vpop.f32.mrf.mxu3 }
 0x107   :  { %v547_v4 = vadd.f32 %v546_v44, %v497_v43 }
 0x108   :  { %v1668_v47 = vpop.f32.mrf.mxu1  ;;  %597 = vmatmul.bf16.gmra.mxu2 %v1604_v42  ;;  %895 = vmatmul.f32.gmra.mxu0 %v803_v10  ;;  %v999_v42 = vld [vmem:[%s1783_s5] sm:$0x3]  ;;  %s1515_s5 = smov [#allocation12]  }
 0x109   :  { %v1671_v48 = vmul.f32 %v1625_v3, %v547_v4  ;;  %v1688_v59 = vperm.slane %v999_v42, 0  ;;  %v1701_v20 = vperm.slane %v999_v42, 1  ;;  %v530_v36 = vadd.f32 %v1668_v47, %v1666_v45  ;;  %s1073_s21 = sshll.u32 %s1515_s5, 4  ;;  %s1074_s21 = int_to_ptr.vmem [resolvable:$true] %s1073_s21 }
 0x10b   :  { %646 = vmatmul.bf16.gmra.mxu3 %v1606_v46  ;;  %960 = vmatmul.f32.gmra.mxu1 %v803_v10  ;;  %v500_v49 = vpop.f32.mrf.mxu2  ;;  %v763_v10 = vmul.f32 %v1625_v3, %v522_v15 }
 0x10d   :  { %v1675_v52 = vpop.f32.mrf.mxu0 }
 0x10e   :  { %v549_v50 = vpop.f32.mrf.mxu3 }
 0x10f   :  { %v550_v51 = vadd.f32 %v549_v50, %v500_v49 }
 0x110   :  { %v1677_v54 = vpop.f32.mrf.mxu1  ;;  %898 = vmatmul.f32.gmra.mxu0 %v804_v53 }
 0x111   :  { %v1680_v55 = vmul.f32 %v1625_v3, %v550_v51  ;;  %v532_v45 = vadd.f32 %v1677_v54, %v1675_v52 }
 0x113   :  { %963 = vmatmul.f32.gmra.mxu1 %v804_v53  ;;  %v502_v46 = vpop.f32.mrf.mxu2 }
 0x115   :  { %v854_v1 = vpop.f32.mrf.mxu0 }
 0x116   :  { %v551_v57 = vpop.f32.mrf.mxu3  ;;  %v967_v7 = vadd.f32 %v854_v1, %v757_v58 }
 0x117   :  { %v552_v60 = vadd.f32 %v551_v57, %v502_v46 }
 0x118   :  { %v919_v33 = vpop.f32.mrf.mxu1  ;;  %v1005_v62 = vadd.f32 %v1688_v59, %v967_v7 }
 0x119   :  { %v1691_v61 = vmul.f32 %v1625_v3, %v552_v60  ;;  %v765_v60 = vmul.f32 %v1625_v3, %v525_v22 }
 0x11a   :  { %1037 = vst [vmem:[#allocation12] sm:$0xff] %v1005_v62 }
 0x11b   :  { %v563_v0 = vpop.f32.mrf.mxu2 }
 0x11d   :  { %v857_v14 = vpop.f32.mrf.mxu0 }
 0x11e   :  { %v612_v8 = vpop.f32.mrf.mxu3  ;;  %v969_v6 = vadd.f32 %v857_v14, %v759_v11  ;;  %v767_v14 = vmul.f32 %v1625_v3, %v527_v28 }
 0x11f   :  { %v613_v2 = vadd.f32 %v612_v8, %v563_v0 }
 0x120   :  { %v922_v16 = vpop.f32.mrf.mxu1  ;;  %v1007_v12 = vadd.f32 %v1688_v59, %v969_v6 }
 0x121   :  { %v758_v19 = vmul.f32 %v1697_v5, %v613_v2 }
 0x122   :  { %1039 = vst [vmem:[#allocation12 + $0x10] sm:$0xff] %v1007_v12 }
 0x123   :  { %v968_v21 = vadd.f32 %v919_v33, %v758_v19  ;;  %v565_v23 = vpop.f32.mrf.mxu2 }
 0x125   :  { %v1006_v63 = vadd.f32 %v1701_v20, %v968_v21  ;;  %v860_v38 = vpop.f32.mrf.mxu0 }
 0x126   :  { %v614_v26 = vpop.f32.mrf.mxu3  ;;  %v971_v31 = vadd.f32 %v860_v38, %v761_v27  ;;  %v769_v27 = vmul.f32 %v1625_v3, %v530_v36 }
 0x127   :  { %1038 = vst [vmem:[#allocation12 + $0x8] sm:$0xff] %v1006_v63  ;;  %v615_v34 = vadd.f32 %v614_v26, %v565_v23 }
 0x128   :  { %v925_v32 = vpop.f32.mrf.mxu1  ;;  %v1009_v17 = vadd.f32 %v1688_v59, %v971_v31 }
 0x129   :  { %v760_v35 = vmul.f32 %v1697_v5, %v615_v34 }
 0x12a   :  { %1041 = vst [vmem:[#allocation12 + $0x20] sm:$0xff] %v1009_v17 }
 0x12b   :  { %v970_v37 = vadd.f32 %v922_v16, %v760_v35  ;;  %v568_v44 = vpop.f32.mrf.mxu2 }
 0x12d   :  { %v1008_v43 = vadd.f32 %v1701_v20, %v970_v37  ;;  %v863_v50 = vpop.f32.mrf.mxu0 }
 0x12e   :  { %v617_v4 = vpop.f32.mrf.mxu3  ;;  %v973_v51 = vadd.f32 %v863_v50, %v763_v10 }
 0x12f   :  { %1040 = vst [vmem:[#allocation12 + $0x18] sm:$0xff] %v1008_v43  ;;  %v618_v49 = vadd.f32 %v617_v4, %v568_v44  ;;  %v771_v44 = vmul.f32 %v1625_v3, %v532_v45 }
 0x130   :  { %v928_v53 = vpop.f32.mrf.mxu1  ;;  %v1011_v24 = vadd.f32 %v1688_v59, %v973_v51 }
 0x131   :  { %v762_v56 = vmul.f32 %v1697_v5, %v618_v49 }
 0x132   :  { %1043 = vst [vmem:[#allocation12 + $0x30] sm:$0xff] %v1011_v24 }
 0x133   :  { %v972_v42 = vadd.f32 %v925_v32, %v762_v56  ;;  %v570_v57 = vpop.f32.mrf.mxu2 }
 0x135   :  { %v1010_v46 = vadd.f32 %v1701_v20, %v972_v42  ;;  %v866_v7 = vpop.f32.mrf.mxu0 }
 0x136   :  { %v619_v58 = vpop.f32.mrf.mxu3  ;;  %v975_v33 = vadd.f32 %v866_v7, %v765_v60 }
 0x137   :  { %1042 = vst [vmem:[#allocation12 + $0x28] sm:$0xff] %v1010_v46  ;;  %v620_v1 = vadd.f32 %v619_v58, %v570_v57 }
 0x138   :  { %v931_v39 = vpop.f32.mrf.mxu1  ;;  %v1013_v29 = vadd.f32 %v1688_v59, %v975_v33 }
 0x139   :  { %v764_v62 = vmul.f32 %v1697_v5, %v620_v1 }
 0x13a   :  { %1045 = vst [vmem:[#allocation12 + $0x40] sm:$0xff] %v1013_v29 }
 0x13b   :  { %v974_v0 = vadd.f32 %v928_v53, %v764_v62  ;;  %v573_v11 = vpop.f32.mrf.mxu2 }
 0x13d   :  { %v1012_v8 = vadd.f32 %v1701_v20, %v974_v0  ;;  %v869_v16 = vpop.f32.mrf.mxu0 }
 0x13e   :  { %v622_v2 = vpop.f32.mrf.mxu3  ;;  %v977_v19 = vadd.f32 %v869_v16, %v767_v14 }
 0x13f   :  { %1044 = vst [vmem:[#allocation12 + $0x38] sm:$0xff] %v1012_v8  ;;  %v623_v6 = vadd.f32 %v622_v2, %v573_v11 }
 0x140   :  { %v934_v9 = vpop.f32.mrf.mxu1  ;;  %v1015_v40 = vadd.f32 %v1688_v59, %v977_v19 }
 0x141   :  { %v766_v12 = vmul.f32 %v1697_v5, %v623_v6 }
 0x142   :  { %1047 = vst [vmem:[#allocation12 + $0x50] sm:$0xff] %v1015_v40 }
 0x143   :  { %v976_v21 = vadd.f32 %v931_v39, %v766_v12  ;;  %v575_v23 = vpop.f32.mrf.mxu2 }
 0x145   :  { %v1014_v63 = vadd.f32 %v1701_v20, %v976_v21  ;;  %v872_v38 = vpop.f32.mrf.mxu0 }
 0x146   :  { %v624_v26 = vpop.f32.mrf.mxu3  ;;  %v979_v31 = vadd.f32 %v872_v38, %v769_v27 }
 0x147   :  { %1046 = vst [vmem:[#allocation12 + $0x48] sm:$0xff] %v1014_v63  ;;  %v625_v34 = vadd.f32 %v624_v26, %v575_v23 }
 0x148   :  { %v937_v32 = vpop.f32.mrf.mxu1  ;;  %v1017_v47 = vadd.f32 %v1688_v59, %v979_v31 }
 0x149   :  { %v768_v35 = vmul.f32 %v1697_v5, %v625_v34 }
 0x14a   :  { %1049 = vst [vmem:[#allocation12 + $0x60] sm:$0xff] %v1017_v47 }
 0x14b   :  { %v978_v15 = vadd.f32 %v934_v9, %v768_v35  ;;  %v578_v37 = vpop.f32.mrf.mxu2 }
 0x14d   :  { %v1016_v17 = vadd.f32 %v1701_v20, %v978_v15  ;;  %v875_v10 = vpop.f32.mrf.mxu0 }
 0x14e   :  { %v627_v43 = vpop.f32.mrf.mxu3  ;;  %v981_v49 = vadd.f32 %v875_v10, %v771_v44 }
 0x14f   :  { %1048 = vst [vmem:[#allocation12 + $0x58] sm:$0xff] %v1016_v17  ;;  %v628_v4 = vadd.f32 %v627_v43, %v578_v37 }
 0x150   :  { %v940_v50 = vpop.f32.mrf.mxu1  ;;  %v1019_v53 = vadd.f32 %v1688_v59, %v981_v49 }
 0x151   :  { %v770_v51 = vmul.f32 %v1697_v5, %v628_v4 }
 0x152   :  { %1051 = vst [vmem:[#allocation12 + $0x70] sm:$0xff] %v1019_v53 }
 0x153   :  { %v980_v52 = vadd.f32 %v937_v32, %v770_v51  ;;  %v580_v56 = vpop.f32.mrf.mxu2 }
 0x155   :  { %v1018_v54 = vadd.f32 %v1701_v20, %v980_v52  ;;  %v878_v42 = vpop.f32.mrf.mxu0 }
 0x156   :  { %v629_v22 = vpop.f32.mrf.mxu3  ;;  %v983_v3 = vadd.f32 %v878_v42, %v1632_v13 }
 0x157   :  { %1050 = vst [vmem:[#allocation12 + $0x68] sm:$0xff] %v1018_v54  ;;  %v630_v24 = vadd.f32 %v629_v22, %v580_v56 }
 0x158   :  { %v943_v46 = vpop.f32.mrf.mxu1  ;;  %v1021_v58 = vadd.f32 %v1688_v59, %v983_v3 }
 0x159   :  { %v772_v57 = vmul.f32 %v1697_v5, %v630_v24 }
 0x15a   :  { %1053 = vst [vmem:[#allocation12 + $0x80] sm:$0xff] %v1021_v58 }
 0x15b   :  { %v982_v60 = vadd.f32 %v940_v50, %v772_v57  ;;  %v583_v7 = vpop.f32.mrf.mxu2 }
 0x15d   :  { %v1020_v1 = vadd.f32 %v1701_v20, %v982_v60  ;;  %v881_v62 = vpop.f32.mrf.mxu0 }
 0x15e   :  { %v632_v33 = vpop.f32.mrf.mxu3  ;;  %v985_v28 = vadd.f32 %v881_v62, %v1639_v18 }
 0x15f   :  { %1052 = vst [vmem:[#allocation12 + $0x78] sm:$0xff] %v1020_v1  ;;  %v633_v39 = vadd.f32 %v632_v33, %v583_v7 }
 0x160   :  { %v946_v29 = vpop.f32.mrf.mxu1  ;;  %v1023_v13 = vadd.f32 %v1688_v59, %v985_v28 }
 0x161   :  { %v774_v0 = vmul.f32 %v1697_v5, %v633_v39 }
 0x162   :  { %1055 = vst [vmem:[#allocation12 + $0x90] sm:$0xff] %v1023_v13 }
 0x163   :  { %v984_v8 = vadd.f32 %v943_v46, %v774_v0  ;;  %v585_v2 = vpop.f32.mrf.mxu2 }
 0x165   :  { %v1022_v11 = vadd.f32 %v1701_v20, %v984_v8  ;;  %v884_v16 = vpop.f32.mrf.mxu0 }
 0x166   :  { %v634_v14 = vpop.f32.mrf.mxu3  ;;  %v987_v19 = vadd.f32 %v884_v16, %v1648_v25 }
 0x167   :  { %1054 = vst [vmem:[#allocation12 + $0x88] sm:$0xff] %v1022_v11  ;;  %v635_v6 = vadd.f32 %v634_v14, %v585_v2 }
 0x168   :  { %v949_v9 = vpop.f32.mrf.mxu1  ;;  %v1025_v18 = vadd.f32 %v1688_v59, %v987_v19 }
 0x169   :  { %v776_v12 = vmul.f32 %v1697_v5, %v635_v6 }
 0x16a   :  { %1057 = vst [vmem:[#allocation12 + $0xa0] sm:$0xff] %v1025_v18 }
 0x16b   :  { %v986_v36 = vadd.f32 %v946_v29, %v776_v12  ;;  %v588_v21 = vpop.f32.mrf.mxu2 }
 0x16d   :  { %v1024_v40 = vadd.f32 %v1701_v20, %v986_v36  ;;  %v887_v26 = vpop.f32.mrf.mxu0 }
 0x16e   :  { %v637_v63 = vpop.f32.mrf.mxu3  ;;  %v989_v27 = vadd.f32 %v887_v26, %v1655_v30 }
 0x16f   :  { %1056 = vst [vmem:[#allocation12 + $0x98] sm:$0xff] %v1024_v40  ;;  %v638_v23 = vadd.f32 %v637_v63, %v588_v21 }
 0x170   :  { %v952_v34 = vpop.f32.mrf.mxu1  ;;  %v1027_v25 = vadd.f32 %v1688_v59, %v989_v27 }
 0x171   :  { %v778_v38 = vmul.f32 %v1697_v5, %v638_v23 }
 0x172   :  { %1059 = vst [vmem:[#allocation12 + $0xb0] sm:$0xff] %v1027_v25 }
 0x173   :  { %v988_v31 = vadd.f32 %v949_v9, %v778_v38  ;;  %v590_v35 = vpop.f32.mrf.mxu2 }
 0x175   :  { %v1026_v32 = vadd.f32 %v1701_v20, %v988_v31  ;;  %v890_v15 = vpop.f32.mrf.mxu0 }
 0x176   :  { %v639_v45 = vpop.f32.mrf.mxu3  ;;  %v991_v17 = vadd.f32 %v890_v15, %v1664_v41 }
 0x177   :  { %1058 = vst [vmem:[#allocation12 + $0xa8] sm:$0xff] %v1026_v32  ;;  %v640_v47 = vadd.f32 %v639_v45, %v590_v35 }
 0x178   :  { %v1029_v30 = vadd.f32 %v1688_v59, %v991_v17  ;;  %v955_v43 = vpop.f32.mrf.mxu1 }
 0x179   :  { %v780_v37 = vmul.f32 %v1697_v5, %v640_v47 }
 0x17a   :  { %1061 = vst [vmem:[#allocation12 + $0xc0] sm:$0xff] %v1029_v30 }
 0x17b   :  { %v990_v44 = vadd.f32 %v952_v34, %v780_v37  ;;  %v593_v10 = vpop.f32.mrf.mxu2 }
 0x17d   :  { %v1028_v4 = vadd.f32 %v1701_v20, %v990_v44  ;;  %v893_v51 = vpop.f32.mrf.mxu0 }
 0x17e   :  { %v642_v49 = vpop.f32.mrf.mxu3  ;;  %v993_v53 = vadd.f32 %v893_v51, %v1671_v48 }
 0x17f   :  { %1060 = vst [vmem:[#allocation12 + $0xb8] sm:$0xff] %v1028_v4  ;;  %v643_v50 = vadd.f32 %v642_v49, %v593_v10 }
 0x180   :  { %v1031_v41 = vadd.f32 %v1688_v59, %v993_v53  ;;  %v958_v56 = vpop.f32.mrf.mxu1 }
 0x181   :  { %v782_v52 = vmul.f32 %v1697_v5, %v643_v50 }
 0x182   :  { %1063 = vst [vmem:[#allocation12 + $0xd0] sm:$0xff] %v1031_v41 }
 0x183   :  { %v992_v54 = vadd.f32 %v955_v43, %v782_v52  ;;  %v595_v24 = vpop.f32.mrf.mxu2 }
 0x185   :  { %v1030_v22 = vadd.f32 %v1701_v20, %v992_v54  ;;  %v896_v46 = vpop.f32.mrf.mxu0 }
 0x186   :  { %v644_v42 = vpop.f32.mrf.mxu3  ;;  %v995_v57 = vadd.f32 %v896_v46, %v1680_v55 }
 0x187   :  { %1062 = vst [vmem:[#allocation12 + $0xc8] sm:$0xff] %v1030_v22  ;;  %v645_v3 = vadd.f32 %v644_v42, %v595_v24 }
 0x188   :  { %v1033_v48 = vadd.f32 %v1688_v59, %v995_v57  ;;  %v961_v39 = vpop.f32.mrf.mxu1 }
 0x189   :  { %v784_v58 = vmul.f32 %v1697_v5, %v645_v3 }
 0x18a   :  { %1065 = vst [vmem:[#allocation12 + $0xe0] sm:$0xff] %v1033_v48 }
 0x18b   :  { %v994_v60 = vadd.f32 %v958_v56, %v784_v58  ;;  %v598_v7 = vpop.f32.mrf.mxu2 }
 0x18d   :  { %v1032_v1 = vadd.f32 %v1701_v20, %v994_v60  ;;  %v899_v28 = vpop.f32.mrf.mxu0 }
 0x18e   :  { %v647_v33 = vpop.f32.mrf.mxu3  ;;  %v997_v29 = vadd.f32 %v899_v28, %v1691_v61 }
 0x18f   :  { %1064 = vst [vmem:[#allocation12 + $0xd8] sm:$0xff] %v1032_v1  ;;  %v648_v62 = vadd.f32 %v647_v33, %v598_v7 }
 0x190   :  { %v1035_v55 = vadd.f32 %v1688_v59, %v997_v29  ;;  %v964_v6 = vpop.f32.mrf.mxu1 }
 0x191   :  { %v786_v0 = vmul.f32 %v1697_v5, %v648_v62 }
 0x192   :  { %1067 = vst [vmem:[#allocation12 + $0xf0] sm:$0xff] %v1035_v55 }
 0x193   :  { %v996_v13 = vadd.f32 %v961_v39, %v786_v0  ;;  %v600_v11 = vpop.f32.mrf.mxu2 }
 0x195   :  { %v1034_v8 = vadd.f32 %v1701_v20, %v996_v13 }
 0x196   :  { %v649_v2 = vpop.f32.mrf.mxu3 }
 0x197   :  { %1066 = vst [vmem:[#allocation12 + $0xe8] sm:$0xff] %v1034_v8  ;;  %v650_v14 = vadd.f32 %v649_v2, %v600_v11 }
 0x199   :  { %v788_v16 = vmul.f32 %v1697_v5, %v650_v14 }
 0x19b   :  { %v998_v61 = vadd.f32 %v964_v6, %v788_v16 }
 0x19d   :  { %v1036_v59 = vadd.f32 %v1701_v20, %v998_v61 }
 0x19f   :  { %1068 = vst [vmem:[#allocation12 + $0xf8] sm:$0xff] %v1036_v59 }
 0x1a0   :  { %1081 = dma.vmem_to_hbm [thread:$0]  %s1074_s21, 4096, %s1076_s24, [#allocation5], %s1516_s25, %s1516_s25, %s1517_s26  }
 0x1a1   :  { %1506 = dma.done.wait [#allocation5], 4096  }
 0x1a2   :  { %1507 = vsyncadd [#allocation5], 4294963200 }
 0x1a3   :  { %1086 = vsyncpa [#allocation4], 1 }
 0x1a4   :  { %1087 = vsyncpa [#allocation7], 1 }
 0x1a5   :  { %1088 = vsyncpa [#allocation10], 1 }
 0x1a6   :  { %1089 = vsyncpa [#allocation5], 1 }

</bundles_post_ra>
